<compile_context>
chip_gen: v7x
topology: tpu7x:2x2x1
jax: 0.10.0
libtpu: 0.0.40
codegen_flags: <defaults>
</compile_context>

<pallas_src>
import functools

import jax
import jax.numpy as jnp
from jax import lax
from jax.experimental import pallas as pl
from jax.experimental.pallas import tpu as pltpu


_LANES = 128
_TARGET_BLOCK_BYTES = 2 * 1024 * 1024  # ~2 MiB input tile; safe on v5e/v6e/v7x


def _sublane_multiple(dtype):
    itemsize = int(jnp.dtype(dtype).itemsize)
    return max(8, 32 // max(itemsize, 1))  # 8 for f32, 16 for bf16, 32 for int8


def _resolve_block_rows(rows, feat, dtype, block_rows):
    sub = _sublane_multiple(dtype)
    if block_rows is None:
        itemsize = int(jnp.dtype(dtype).itemsize)
        br = _TARGET_BLOCK_BYTES // max(feat * itemsize, 1)
        br = max(sub, (br // sub) * sub)
    else:
        br = max(1, int(block_rows))
    if br >= rows:
        return rows  # full-extent block is always legal
    return max(sub, (br // sub) * sub)


def _ln_kernel(x_ref, g_ref, b_ref, o_ref, *, eps, inv_n):
    # x_ref: (tm, F) tile; normalize each row over the lane (last) axis.
    x = x_ref[...].astype(jnp.float32)
    g = g_ref[...].astype(jnp.float32)
    b = b_ref[...].astype(jnp.float32)
    # One-pass stats: both reductions issued before any subtract (less XLU
    # traffic and a shorter per-tile dependency chain).
    mean = jnp.sum(x, axis=-1, keepdims=True) * inv_n
    ex2 = jnp.sum(x * x, axis=-1, keepdims=True) * inv_n
    var = ex2 - mean * mean
    inv = lax.rsqrt(var + eps)          # EUP slot
    scale = inv * g                     # fold gamma into inverse-std
    o_ref[...] = ((x - mean) * scale + b).astype(o_ref.dtype)


def _ln_packed_kernel(x_ref, s_ref, g_ref, b_ref, o_ref, *, eps):
    # x_ref: (tm, 128) tile holding 128 // F independent LayerNorm groups per
    # row (lane-dense packing for F < 128). Per-group means are computed with
    # the MXU via the block-diagonal averaging matrix s_ref (128, 128), which
    # also broadcasts each group's statistic back to every lane of the group.
    x = x_ref[...].astype(jnp.float32)
    s = s_ref[...]
    g = g_ref[...].astype(jnp.float32)
    b = b_ref[...].astype(jnp.float32)
    mean = jnp.dot(x, s, preferred_element_type=jnp.float32)       # E[x]
    ex2 = jnp.dot(x * x, s, preferred_element_type=jnp.float32)    # E[x^2]
    var = ex2 - mean * mean
    inv = lax.rsqrt(var + eps)          # EUP slot
    scale = inv * g                     # fold gamma into inverse-std
    o_ref[...] = ((x - mean) * scale + b).astype(o_ref.dtype)


def layer_norm(x, gamma, beta, *, eps=1e-05, block_rows=None):
    """LayerNorm over the last dim of x. x: (..., F); gamma, beta: (F,)."""
    orig_shape = x.shape
    F = orig_shape[-1]
    rows = 1
    for d in orig_shape[:-1]:
        rows *= d
    x2 = x.reshape(rows, F)

    compiler_params = pltpu.CompilerParams(dimension_semantics=("parallel",))

    use_packed = (F < _LANES) and (_LANES % F == 0) and (rows % (_LANES // F) == 0)

    if use_packed:
        # Lane-dense path: pack G rows of width F into one 128-lane row.
        G = _LANES // F
        rows_p = rows // G
        feat_p = _LANES
        xk = x2.reshape(rows_p, feat_p)                 # metadata-only reshape
        g2 = jnp.tile(gamma.reshape(1, F), (1, G))      # (1, 128)
        b2 = jnp.tile(beta.reshape(1, F), (1, G))       # (1, 128)
        lane_group = jnp.arange(_LANES, dtype=jnp.int32) // F
        seg = (lane_group[:, None] == lane_group[None, :]).astype(jnp.float32)
        seg = seg * (1.0 / F)                           # block-diag averaging mat

        br = _resolve_block_rows(rows_p, feat_p, x.dtype, block_rows)
        grid = (pl.cdiv(rows_p, br),)
        out = pl.pallas_call(
            functools.partial(_ln_packed_kernel, eps=eps),
            out_shape=jax.ShapeDtypeStruct((rows_p, feat_p), x.dtype),
            grid_spec=pltpu.PrefetchScalarGridSpec(
                num_scalar_prefetch=0,
                grid=grid,
                in_specs=[
                    pl.BlockSpec((br, feat_p), lambda i: (i, 0)),
                    pl.BlockSpec((_LANES, _LANES), lambda i: (0, 0)),
                    pl.BlockSpec((1, feat_p), lambda i: (0, 0)),
                    pl.BlockSpec((1, feat_p), lambda i: (0, 0)),
                ],
                out_specs=pl.BlockSpec((br, feat_p), lambda i: (i, 0)),
            ),
            compiler_params=compiler_params,
        )(xk, seg, g2, b2)
        return out.reshape(orig_shape)

    # General path (F >= 128, or not cleanly packable).
    g2 = gamma.reshape(1, F)
    b2 = beta.reshape(1, F)
    br = _resolve_block_rows(rows, F, x.dtype, block_rows)
    grid = (pl.cdiv(rows, br),)
    out = pl.pallas_call(
        functools.partial(_ln_kernel, eps=eps, inv_n=1.0 / F),
        out_shape=jax.ShapeDtypeStruct((rows, F), x.dtype),
        grid_spec=pltpu.PrefetchScalarGridSpec(
            num_scalar_prefetch=0,
            grid=grid,
            in_specs=[
                pl.BlockSpec((br, F), lambda i: (i, 0)),
                pl.BlockSpec((1, F), lambda i: (0, 0)),
                pl.BlockSpec((1, F), lambda i: (0, 0)),
            ],
            out_specs=pl.BlockSpec((br, F), lambda i: (i, 0)),
        ),
        compiler_params=compiler_params,
    )(x2, g2, b2)
    return out.reshape(orig_shape)


def _reference_ln(x, gamma, beta, eps):
    mean = jnp.mean(x, axis=-1, keepdims=True)
    var = jnp.mean((x - mean) ** 2, axis=-1, keepdims=True)
    return (x - mean) / jnp.sqrt(var + eps) * gamma + beta


if __name__ == "__main__":
    # Module: LayerNorm(num_features=32) applied to x of shape (2, 8, 32),
    # normalizing over the last (feature) dim, with elementwise affine
    # (default init: weight = 1, bias = 0).
    num_features = 32
    key = jax.random.PRNGKey(0)
    x = jax.random.normal(key, (2, 8, num_features), dtype=jnp.float32)
    gamma = jnp.ones((num_features,), dtype=jnp.float32)
    beta = jnp.zeros((num_features,), dtype=jnp.float32)

    out = layer_norm(x, gamma, beta, eps=1e-05)          # lane-packed MXU path
    out = jax.block_until_ready(out)
    ref = _reference_ln(x, gamma, beta, 1e-05)
    assert out.shape == x.shape
    assert jnp.max(jnp.abs(out - ref)) < 1e-4

    # Also exercise the general (F >= 128) path once.
    f2 = 256
    x2 = jax.random.normal(jax.random.PRNGKey(0), (2, 8, f2), dtype=jnp.float32)
    g2 = jnp.ones((f2,), dtype=jnp.float32)
    b2 = jnp.zeros((f2,), dtype=jnp.float32)
    out2 = jax.block_until_ready(layer_norm(x2, g2, b2, eps=1e-05))
    ref2 = _reference_ln(x2, g2, b2, 1e-05)
    assert out2.shape == x2.shape
    assert jnp.max(jnp.abs(out2 - ref2)) < 1e-4

    print("KERNEL_OK")
</pallas_src>

<mosaic_0001>
module attributes {stable_mosaic.version = 11 : i64} {
  func.func @_ln_packed_kernel(%arg0: i32, %arg1: memref<4x128xf32, #tpu.memory_space<vmem>>, %arg2: memref<128x128xf32, #tpu.memory_space<vmem>>, %arg3: memref<1x128xf32, #tpu.memory_space<vmem>>, %arg4: memref<1x128xf32, #tpu.memory_space<vmem>>, %arg5: memref<4x128xf32, #tpu.memory_space<vmem>>) attributes {dimension_semantics = [#tpu.dimension_semantics<parallel>], iteration_bounds = array<i64: 1>, scalar_prefetch = 0 : i64, scratch_operands = 0 : i64, tpu.core_type = #tpu.core_type<tc>, window_params = [{transform_indices = @transform_0, window_bounds = array<i64: 4, 128>}, {pipeline_mode = #tpu.pipeline_mode<synchronous>, transform_indices = @transform_1, window_bounds = array<i64: 128, 128>}, {pipeline_mode = #tpu.pipeline_mode<synchronous>, transform_indices = @transform_2, window_bounds = array<i64: 1, 128>}, {pipeline_mode = #tpu.pipeline_mode<synchronous>, transform_indices = @transform_3, window_bounds = array<i64: 1, 128>}, {transform_indices = @transform_4, window_bounds = array<i64: 4, 128>}]} {
    %c0 = arith.constant 0 : index
    %c0_0 = arith.constant 0 : index
    %0 = vector.load %arg1[%c0, %c0_0] : memref<4x128xf32, #tpu.memory_space<vmem>>, vector<4x128xf32>
    %c0_1 = arith.constant 0 : index
    %c0_2 = arith.constant 0 : index
    %1 = vector.load %arg2[%c0_1, %c0_2] : memref<128x128xf32, #tpu.memory_space<vmem>>, vector<128x128xf32>
    %c0_3 = arith.constant 0 : index
    %c0_4 = arith.constant 0 : index
    %2 = vector.load %arg3[%c0_3, %c0_4] : memref<1x128xf32, #tpu.memory_space<vmem>>, vector<1x128xf32>
    %c0_5 = arith.constant 0 : index
    %c0_6 = arith.constant 0 : index
    %3 = vector.load %arg4[%c0_5, %c0_6] : memref<1x128xf32, #tpu.memory_space<vmem>>, vector<1x128xf32>
    %cst = arith.constant dense<0.000000e+00> : vector<4x128xf32>
    %4 = tpu.matmul %0, %1, %cst {dimension_numbers = #tpu.dot_dimension_numbers<[1], [0], [0], [1], [0, 0, 1, 1], [], []>} : vector<4x128xf32>, vector<128x128xf32>, vector<4x128xf32> -> vector<4x128xf32>
    %5 = arith.mulf %0, %0 : vector<4x128xf32>
    %cst_7 = arith.constant dense<0.000000e+00> : vector<4x128xf32>
    %6 = tpu.matmul %5, %1, %cst_7 {dimension_numbers = #tpu.dot_dimension_numbers<[1], [0], [0], [1], [0, 0, 1, 1], [], []>} : vector<4x128xf32>, vector<128x128xf32>, vector<4x128xf32> -> vector<4x128xf32>
    %7 = arith.mulf %4, %4 : vector<4x128xf32>
    %8 = arith.subf %6, %7 : vector<4x128xf32>
    %cst_8 = arith.constant 9.99999974E-6 : f32
    %9 = vector.broadcast %cst_8 : f32 to vector<4x128xf32>
    %10 = arith.addf %8, %9 : vector<4x128xf32>
    %11 = math.rsqrt %10 : vector<4x128xf32>
    %12 = vector.broadcast %2 : vector<1x128xf32> to vector<4x128xf32>
    %13 = arith.mulf %11, %12 : vector<4x128xf32>
    %14 = arith.subf %0, %4 : vector<4x128xf32>
    %15 = arith.mulf %14, %13 : vector<4x128xf32>
    %16 = vector.broadcast %3 : vector<1x128xf32> to vector<4x128xf32>
    %17 = arith.addf %15, %16 : vector<4x128xf32>
    %c0_9 = arith.constant 0 : index
    %c0_10 = arith.constant 0 : index
    %18 = vector.load %arg5[%c0_9, %c0_10] : memref<4x128xf32, #tpu.memory_space<vmem>>, vector<4x128xf32>
    tpu.vector_store %arg5[%c0_9, %c0_10], %17 {strides = array<i32>} : memref<4x128xf32, #tpu.memory_space<vmem>>, vector<4x128xf32>,
    return
  }
  func.func @transform_0(%arg0: i32) -> (i32, i32) {
    %c0_i32 = arith.constant 0 : i32
    %c0_i32_0 = arith.constant 0 : i32
    return %arg0, %c0_i32 : i32, i32
  }
  func.func @transform_1(%arg0: i32) -> (i32, i32) {
    %c0_i32 = arith.constant 0 : i32
    %c0_i32_0 = arith.constant 0 : i32
    %c0_i32_1 = arith.constant 0 : i32
    return %c0_i32, %c0_i32_0 : i32, i32
  }
  func.func @transform_2(%arg0: i32) -> (i32, i32) {
    %c0_i32 = arith.constant 0 : i32
    %c0_i32_0 = arith.constant 0 : i32
    %c0_i32_1 = arith.constant 0 : i32
    return %c0_i32, %c0_i32_0 : i32, i32
  }
  func.func @transform_3(%arg0: i32) -> (i32, i32) {
    %c0_i32 = arith.constant 0 : i32
    %c0_i32_0 = arith.constant 0 : i32
    %c0_i32_1 = arith.constant 0 : i32
    return %c0_i32, %c0_i32_0 : i32, i32
  }
  func.func @transform_4(%arg0: i32) -> (i32, i32) {
    %c0_i32 = arith.constant 0 : i32
    %c0_i32_0 = arith.constant 0 : i32
    return %arg0, %c0_i32 : i32, i32
  }
}

</mosaic_0001>

<bundles_post_ra>
// kernel: tpu_custom_call.1
= control target key start
LH: loop header
LB: loop body
LE: loop exit
PB: predicated region body
PF: predicated region fallthrough
CT: control target
= control target key end

     0   :  { %9 = vsyncpa [#allocation3], 0  ;;  %s559_s0 = inlined_call_operand.hbm [shape: f32[4,128], index: 0, kind: input, shape index: {}]   ;;  %s560_s1 = inlined_call_operand.hbm [shape: f32[128,128], index: 1, kind: input, shape index: {}]   ;;  %s561_s2 = inlined_call_operand.vmem [shape: f32[1,128], index: 2, kind: input, shape index: {}]   ;;  %s562_s3 = inlined_call_operand.vmem [shape: f32[1,128], index: 3, kind: input, shape index: {}]   ;;  %s563_s4 = inlined_call_operand.hbm [shape: f32[4,128], index: 4, kind: output, shape index: {}]  }
   0x1   :  { %10 = vsyncpa [#allocation6], 0 }
   0x2   :  { %11 = vsyncpa [#allocation4], 0  ;;  %s477_s15 = smov [#allocation2]   ;;  %s478_s17 = smov [#allocation5]  }
   0x3   :  { %s18_s16 = sshll.u32 %s477_s15, 4  ;;  %s27_s18 = sshll.u32 %s478_s17, 4  ;;  %s19_s16 = int_to_ptr.vmem [resolvable:$true] %s18_s16  ;;  %s510_s18 = int_to_ptr.vmem [resolvable:$true] %s27_s18 }
   0x4   :  { %s405_s21 = scalar_lea.hbm %s559_s0, 64 }
   0x5   :  { %p406_p0 = scmp.ne.s32.totalorder %s559_s0, %s405_s21  ;;  %p409_p1 = scmp.lt.u32.totalorder %s405_s21, %s559_s0 }
   0x7   :  { %p411_p2 = pnand %p409_p1, %p406_p0 }
   0x9   :  { %414 = shalt.err (!%p411_p2)
}
   0xa   :  { %s415_s26 = scalar_lea.vmem %s19_s16, 64  ;;  %p420_p4 = scmp.lt.s32.totalorder %s19_s16, %s19_s16 }
   0xb   :  { %p416_p3 = scmp.ne.s32.totalorder %s19_s16, %s415_s26  ;;  %p421_p5 = scmp.lt.s32.totalorder %s415_s26, %s415_s26 }
   0xd   :  { %p422_p6 = por %p421_p5, %p420_p4 }
   0xf   :  { %p423_p7 = pnand %p422_p6, %p416_p3 }
  0x11   :  { %426 = shalt.err (!%p423_p7)
}
  0x12   :  { %21 = dma.hbm_to_vmem [thread:$0]  %s559_s0, 64, %s19_s16, [#allocation3]  }
  0x13   :  { %s427_s5 = scalar_lea.hbm %s560_s1, 2048 }
  0x14   :  { %p428_p8 = scmp.ne.s32.totalorder %s560_s1, %s427_s5  ;;  %p431_p9 = scmp.lt.u32.totalorder %s427_s5, %s560_s1 }
  0x16   :  { %p433_p10 = pnand %p431_p9, %p428_p8 }
  0x18   :  { %436 = shalt.err (!%p433_p10)
}
  0x19   :  { %s437_s10 = scalar_lea.vmem %s510_s18, 2048  ;;  %p442_p12 = scmp.lt.s32.totalorder %s510_s18, %s510_s18 }
  0x1a   :  { %p438_p11 = scmp.ne.s32.totalorder %s510_s18, %s437_s10  ;;  %p443_p13 = scmp.lt.s32.totalorder %s437_s10, %s437_s10 }
  0x1c   :  { %p444_p0 = por %p443_p13, %p442_p12 }
  0x1e   :  { %p445_p1 = pnand %p444_p0, %p438_p11 }
  0x20   :  { %448 = shalt.err (!%p445_p1)
}
  0x21   :  { %s479_s0 = smov 128   ;;  %s480_s11 = smov 8  }
  0x22   :  { %33 = dma.hbm_to_vmem [thread:$0]  %s560_s1, 2048, %s510_s18, [#allocation6], %s479_s0, %s479_s0, %s480_s11  }
  0x23   :  { %471 = dma.done.wait [#allocation3], 64  }
  0x24   :  { %472 = vsyncadd [#allocation3], 4294967232 }
  0x25   :  { %473 = dma.done.wait [#allocation6], 2048  }
  0x26   :  { %474 = vsyncadd [#allocation6], 4294965248  ;;  %v481_v0 = vmov 0.0|0.0   ;;  %vm482_vm0 = vmmov 0   ;;  %v483_v1 = vmov 0.0   ;;  %v45_v2 = vld [vmem:[#allocation5] sm:$0xff] }
  0x27   :  { %347 = vmatprep.subr.bf16.mxu0 %v481_v0  ;;  %371 = vmatprep.subr.bf16.mxu1 %v481_v0  ;;  %v46_v3 = vld [vmem:[#allocation5 + $0x8] sm:$0xff]  ;;  %v47_v4 = vld [vmem:[#allocation5 + $0x10] sm:$0xff]  ;;  %v48_v6 = vld [vmem:[#allocation5 + $0x18] sm:$0xff]  ;;  %s484_s17 = smov [#allocation7]  }
  0x28   :  { %309 = vmatprep.mubr.msk.f32.mxu0 %vm482_vm0, %v483_v1  ;;  %344 = vmatprep.mubr.msk.f32.mxu1 %vm482_vm0, %v483_v1  ;;  %v348_v5 = vpack.c.bf16 %v46_v3, %v45_v2  ;;  %v351_v7 = vpack.c.bf16 %v48_v6, %v47_v4  ;;  %v49_v8 = vld [vmem:[#allocation5 + $0x20] sm:$0xff]  ;;  %v50_v9 = vld [vmem:[#allocation5 + $0x28] sm:$0xff]  ;;  %v51_v11 = vld [vmem:[#allocation5 + $0x30] sm:$0xff]  ;;  %s231_s18 = sshll.u32 %s484_s17, 4  ;;  %s232_s18 = int_to_ptr.vmem [resolvable:$true] %s231_s18 }
  0x29   :  { %v354_v10 = vpack.c.bf16 %v50_v9, %v49_v8  ;;  %v52_v12 = vld [vmem:[#allocation5 + $0x38] sm:$0xff]  ;;  %v53_v14 = vld [vmem:[#allocation5 + $0x40] sm:$0xff]  ;;  %v54_v15 = vld [vmem:[#allocation5 + $0x48] sm:$0xff]  ;;  %s449_s19 = scalar_lea.vmem %s232_s18, 64  ;;  %p454_p3 = scmp.lt.s32.totalorder %s232_s18, %s232_s18 }
  0x2a   :  { %349 = vmatpush3.bf16.msra.mxu0 %v348_v5  ;;  %373 = vmatpush3.bf16.msra.mxu1 %v348_v5  ;;  %v357_v13 = vpack.c.bf16 %v52_v12, %v51_v11  ;;  %v360_v16 = vpack.c.bf16 %v54_v15, %v53_v14  ;;  %v55_v17 = vld [vmem:[#allocation5 + $0x50] sm:$0xff]  ;;  %v56_v18 = vld [vmem:[#allocation5 + $0x58] sm:$0xff]  ;;  %v57_v20 = vld [vmem:[#allocation5 + $0x60] sm:$0xff]  ;;  %p450_p2 = scmp.ne.s32.totalorder %s232_s18, %s449_s19  ;;  %p455_p4 = scmp.lt.s32.totalorder %s449_s19, %s449_s19 }
  0x2b   :  { %350 = vmatprep.subr.bf16.mxu0 %v481_v0  ;;  %374 = vmatprep.subr.bf16.mxu1 %v481_v0  ;;  %v363_v19 = vpack.c.bf16 %v56_v18, %v55_v17  ;;  %v58_v21 = vld [vmem:[#allocation5 + $0x68] sm:$0xff]  ;;  %v59_v23 = vld [vmem:[#allocation5 + $0x70] sm:$0xff]  ;;  %v60_v24 = vld [vmem:[#allocation5 + $0x78] sm:$0xff] }
  0x2c   :  { %v366_v22 = vpack.c.bf16 %v58_v21, %v57_v20  ;;  %v369_v25 = vpack.c.bf16 %v60_v24, %v59_v23  ;;  %v44_v26 = vld [vmem:[#allocation2] sm:$0xf]  ;;  %p456_p5 = por %p455_p4, %p454_p3 }
  0x2d   :  { %v133_v27 = vmul.f32 %v44_v26, %v44_v26  ;;  %v241_v35 = vld [vmem:[%s561_s2] ss:$0 sm:$0xff] }
  0x2e   :  { %352 = vmatpush3.bf16.msra.mxu0 %v351_v7  ;;  %376 = vmatpush3.bf16.msra.mxu1 %v351_v7  ;;  %v242_v39 = vld [vmem:[%s562_s3] ss:$0 sm:$0xff]  ;;  %p457_p6 = pnand %p456_p5, %p450_p2 }
  0x2f   :  { %353 = vmatprep.subr.bf16.mxu0 %v481_v0  ;;  %377 = vmatprep.subr.bf16.mxu1 %v481_v0 }
  0x32   :  { %355 = vmatpush3.bf16.msra.mxu0 %v354_v10  ;;  %379 = vmatpush3.bf16.msra.mxu1 %v354_v10 }
  0x33   :  { %356 = vmatprep.subr.bf16.mxu0 %v481_v0  ;;  %380 = vmatprep.subr.bf16.mxu1 %v481_v0 }
  0x36   :  { %358 = vmatpush3.bf16.msra.mxu0 %v357_v13  ;;  %382 = vmatpush3.bf16.msra.mxu1 %v357_v13 }
  0x37   :  { %359 = vmatprep.subr.bf16.mxu0 %v481_v0  ;;  %383 = vmatprep.subr.bf16.mxu1 %v481_v0 }
  0x3a   :  { %361 = vmatpush3.bf16.msra.mxu0 %v360_v16  ;;  %385 = vmatpush3.bf16.msra.mxu1 %v360_v16 }
  0x3b   :  { %362 = vmatprep.subr.bf16.mxu0 %v481_v0  ;;  %386 = vmatprep.subr.bf16.mxu1 %v481_v0 }
  0x3e   :  { %364 = vmatpush3.bf16.msra.mxu0 %v363_v19  ;;  %388 = vmatpush3.bf16.msra.mxu1 %v363_v19 }
  0x3f   :  { %365 = vmatprep.subr.bf16.mxu0 %v481_v0  ;;  %389 = vmatprep.subr.bf16.mxu1 %v481_v0 }
  0x42   :  { %367 = vmatpush3.bf16.msra.mxu0 %v366_v22  ;;  %391 = vmatpush3.bf16.msra.mxu1 %v366_v22 }
  0x43   :  { %368 = vmatprep.subr.bf16.mxu0 %v481_v0  ;;  %392 = vmatprep.subr.bf16.mxu1 %v481_v0 }
  0x46   :  { %370 = vmatpush3.bf16.msra.mxu0 %v369_v25  ;;  %394 = vmatpush3.bf16.msra.mxu1 %v369_v25 }
  0x49   :  { %310 = vmatmul.mubr.f32.vlgmr.msra.gmra.mrb[0].mxu0 %v44_v26  ;;  %345 = vmatmul.mubr.f32.vlgmr.msra.gmra.mrb[0].mxu1 %v133_v27 }
 0x11c   :  { %v129_v28 = vpop.f32.mrb[0].mxu0  ;;  %v200_v29 = vpop.f32.mrb[0].mxu1 }
 0x11d   :  { %v204_v30 = vmul.f32 %v129_v28, %v129_v28  ;;  %v311_v31 = vpop.f32.mrb[1].mxu0  ;;  %v346_v32 = vpop.f32.mrb[1].mxu1  ;;  %v215_v37 = vsub.f32 %v44_v26, %v129_v28 }
 0x11f   :  { %v205_v33 = vsub.f32 %v200_v29, %v204_v30 }
 0x121   :  { %v206_v34 = vadd.f32 1e-05, %v205_v33 }
 0x123   :  { %403 = vrsqrt.f32 %v206_v34 }
 0x12d   :  { %v404_v36 = vpop.eup %403 }
 0x12e   :  { %v214_v38 = vmul.f32 %v404_v36, %v241_v35 }
 0x130   :  { %v216_v40 = vmul.f32 %v215_v37, %v214_v38 }
 0x132   :  { %v223_v41 = vadd.f32 %v242_v39, %v216_v40 }
 0x134   :  { %224 = vst [vmem:[#allocation7] sm:$0xf] %v223_v41 }
 0x135   :  { %460 = shalt.err (!%p457_p6)
}
 0x136   :  { %s461_s21 = scalar_lea.hbm %s563_s4, 64 }
 0x137   :  { %p462_p7 = scmp.ne.s32.totalorder %s563_s4, %s461_s21  ;;  %p465_p8 = scmp.lt.u32.totalorder %s461_s21, %s563_s4 }
 0x139   :  { %p467_p9 = pnand %p465_p8, %p462_p7 }
 0x13b   :  { %470 = shalt.err (!%p467_p9)
}
 0x13c   :  { %234 = dma.vmem_to_hbm [thread:$0]  %s232_s18, 64, %s563_s4, [#allocation4]  }
 0x13d   :  { %475 = dma.done.wait [#allocation4], 64  }
 0x13e   :  { %476 = vsyncadd [#allocation4], 4294967232 }
 0x13f   :  { %238 = vsyncpa [#allocation3], 1 }
 0x140   :  { %239 = vsyncpa [#allocation6], 1 }
 0x141   :  { %240 = vsyncpa [#allocation4], 1 }

</bundles_post_ra>
